<compile_context>
chip_gen: v7x
topology: tpu7x:2x2x1
jax: 0.10.0
libtpu: 0.0.40
codegen_flags: <defaults>
</compile_context>

<pallas_src>
import jax
import jax.numpy as jnp
from jax.experimental import pallas as pl
from jax.experimental.pallas import tpu as pltpu


_MIB = 1024 * 1024
_VMEM_BUDGET = 24 * _MIB     # per-call working-set target (safe on v7x 64 MiB VMEM)
_VMEM_LIMIT = 32 * _MIB      # scoped-VMEM limit passed to Mosaic (raises v5e's 16 MiB)
_SINGLE_K_MAX = 2048         # largest in_features kept as one contraction block
_SPLIT_TK = 1024             # reduction tile when K must be split


def _round_up(x: int, m: int) -> int:
    return ((x + m - 1) // m) * m


def _k_tiling(in_features: int):
    """K (reduction) tiling -- shared by init-time weight padding and forward."""
    if in_features <= _SINGLE_K_MAX:
        return in_features, in_features          # Kp, tk: one block, no padding
    tk = _SPLIT_TK
    return _round_up(in_features, tk), tk


# --------------------------------------------------------------------------
# Kernels
# --------------------------------------------------------------------------

def _proj_kernel_single(x_ref, wt_ref, o_ref):
    """Whole K in one block: no accumulator, write the result directly."""
    o_ref[...] = jnp.dot(
        x_ref[...], wt_ref[...], preferred_element_type=jnp.float32
    ).astype(o_ref.dtype)


def _proj_kernel_acc_f32(x_ref, wt_ref, o_ref):
    """Split-K, f32 output: the output block index ignores k, so o_ref is
    resident in VMEM across the K axis -- accumulate into it directly."""
    part = jnp.dot(x_ref[...], wt_ref[...], preferred_element_type=jnp.float32)

    @pl.when(pl.program_id(2) == 0)
    def _():
        o_ref[...] = part

    @pl.when(pl.program_id(2) > 0)
    def _():
        o_ref[...] += part


def _proj_kernel_acc_scratch(x_ref, wt_ref, o_ref, acc_ref):
    """Split-K, non-f32 output: keep an f32 VMEM accumulator."""
    @pl.when(pl.program_id(2) == 0)
    def _():
        acc_ref[...] = jnp.zeros_like(acc_ref)

    acc_ref[...] += jnp.dot(
        x_ref[...], wt_ref[...], preferred_element_type=jnp.float32
    )

    @pl.when(pl.program_id(2) == pl.num_programs(2) - 1)
    def _():
        o_ref[...] = acc_ref[...].astype(o_ref.dtype)


# --------------------------------------------------------------------------
# Tiling heuristics
# --------------------------------------------------------------------------

def _choose_tiles(B, N, tk, xbytes, wbytes, obytes, out_is_f32):
    tm = min(_round_up(B, 8), 256)
    n_rounded = _round_up(N, 128)

    # Small-batch forward is pure weight-bandwidth bound: stream wide weight
    # tiles (>=1024 lanes needed to approach the HBM roofline).  Large batch
    # keeps tn moderate so the x tile / accumulator stay small.
    tn_target = 2048 if tm <= 64 else 512
    tn = max(128, (min(tn_target, n_rounded) // 128) * 128)

    def working_set(tn_):
        ws = 2 * (tm * tk * xbytes + tk * tn_ * wbytes)   # double-buffered inputs
        ws += tm * tn_ * obytes                           # resident output tile
        if not out_is_f32:
            ws += tm * tn_ * 4                            # f32 scratch accumulator
        return ws

    while working_set(tn) > _VMEM_BUDGET and tn > 128:
        tn = max(128, ((tn // 2) // 128) * 128)

    # v7x megacore: keep >= 2 parallel grid tiles so both TensorCores get work.
    if -(-B // tm) == 1 and -(-N // tn) == 1 and n_rounded >= 256:
        tn = max(128, _round_up(-(-n_rounded // 2), 128))

    return tm, tn


# --------------------------------------------------------------------------
# Forward
# --------------------------------------------------------------------------

def projection_forward(x, weight_t, *, tk=None, vmem_limit_bytes=_VMEM_LIMIT):
    """Computes x @ weight.T with Pallas.

    x:        (batch, in_features)
    weight_t: (Kp, out_features) -- Projection.weight transposed ONCE at init
              time via pack_projection_weight (zero-padded along K only when
              in_features > _SINGLE_K_MAX).
    returns   (batch, out_features), dtype of x.
    """
    B, K = x.shape
    Kp, N = weight_t.shape

    if tk is None:
        Kp_expect, tk = _k_tiling(K)
        assert Kp == Kp_expect, (
            "weight_t must come from pack_projection_weight for this in_features")
    else:
        assert Kp >= K and Kp % tk == 0, "explicit tk must divide weight_t's K dim"

    out_dtype = x.dtype
    xbytes = jnp.dtype(x.dtype).itemsize
    wbytes = jnp.dtype(weight_t.dtype).itemsize
    obytes = jnp.dtype(out_dtype).itemsize
    out_is_f32 = jnp.dtype(out_dtype) == jnp.float32

    tm, tn = _choose_tiles(B, N, tk, xbytes, wbytes, obytes, out_is_f32)

    # Only the reduction (K) axis needs real zeros; M/N edge blocks may
    # over-read garbage that only lands in masked-off output rows/cols.
    xp = x if Kp == K else jnp.pad(x, ((0, 0), (0, Kp - K)))

    nk = Kp // tk
    grid_m = pl.cdiv(B, tm)
    grid_n = pl.cdiv(N, tn)

    cost = pl.CostEstimate(
        flops=2 * B * N * Kp,
        transcendentals=0,
        bytes_accessed=B * Kp * xbytes + grid_m * Kp * N * wbytes + B * N * obytes,
    )
    out_shape = jax.ShapeDtypeStruct((B, N), out_dtype)

    if nk == 1:
        return pl.pallas_call(
            _proj_kernel_single,
            out_shape=out_shape,
            grid_spec=pltpu.PrefetchScalarGridSpec(
                num_scalar_prefetch=0,
                grid=(grid_m, grid_n),
                in_specs=[
                    pl.BlockSpec((tm, Kp), lambda i, j: (i, 0)),
                    pl.BlockSpec((Kp, tn), lambda i, j: (0, j)),
                ],
                out_specs=pl.BlockSpec((tm, tn), lambda i, j: (i, j)),
            ),
            compiler_params=pltpu.CompilerParams(
                dimension_semantics=("parallel", "parallel"),
                vmem_limit_bytes=vmem_limit_bytes,
            ),
            cost_estimate=cost,
        )(xp, weight_t)

    kernel = _proj_kernel_acc_f32 if out_is_f32 else _proj_kernel_acc_scratch
    scratch = [] if out_is_f32 else [pltpu.VMEM((tm, tn), jnp.float32)]
    return pl.pallas_call(
        kernel,
        out_shape=out_shape,
        grid_spec=pltpu.PrefetchScalarGridSpec(
            num_scalar_prefetch=0,
            grid=(grid_m, grid_n, nk),
            in_specs=[
                pl.BlockSpec((tm, tk), lambda i, j, k: (i, k)),
                pl.BlockSpec((tk, tn), lambda i, j, k: (k, j)),
            ],
            out_specs=pl.BlockSpec((tm, tn), lambda i, j, k: (i, j)),
            scratch_shapes=scratch,
        ),
        compiler_params=pltpu.CompilerParams(
            dimension_semantics=("parallel", "parallel", "arbitrary"),
            vmem_limit_bytes=vmem_limit_bytes,
        ),
        cost_estimate=cost,
    )(xp, weight_t)


# --------------------------------------------------------------------------
# Init-time parameter prep (matches Projection.reset_parameters)
# --------------------------------------------------------------------------

def make_projection_weight(key, in_features, out_features, dtype=jnp.float32):
    """normal(0,1) rows, then per-row L2 normalization (F.normalize, dim=1).
    Returns the PyTorch layout (out_features, in_features).  Pass
    dtype=jnp.bfloat16 to halve weight HBM traffic (opt-in)."""
    w = jax.random.normal(key, (out_features, in_features), dtype=jnp.float32)
    norm = jnp.maximum(jnp.sqrt(jnp.sum(w * w, axis=1, keepdims=True)), 1e-12)
    return (w / norm).astype(dtype)


def pack_projection_weight(weight):
    """One-time (init) prep for the kernel: transpose to (in, out) so the
    output is lane-dense along out_features; zero-pad K only if the
    contraction will be split across grid steps.  Done ONCE, never per call."""
    out_features, in_features = weight.shape
    wt = jnp.transpose(weight)
    Kp, _ = _k_tiling(in_features)
    if Kp != in_features:
        wt = jnp.pad(wt, ((0, Kp - in_features), (0, 0)))
    return wt


if __name__ == "__main__":
    key = jax.random.PRNGKey(0)
    kw, kx, kw2, kx2 = jax.random.split(key, 4)

    # --- Case 1: small shapes (single-K-block fast path, no padding at all).
    batch, in_features, out_features = 8, 32, 256
    weight = make_projection_weight(kw, in_features, out_features)
    weight_t = pack_projection_weight(weight)            # init-time, not per call
    x = jax.random.normal(kx, (batch, in_features), dtype=jnp.float32)

    y = jax.block_until_ready(projection_forward(x, weight_t))
    y_ref = x @ weight.T
    assert y.shape == (batch, out_features)
    assert jnp.allclose(y, y_ref, atol=1e-5, rtol=1e-5)

    # --- Case 2: force the split-K path (direct f32 accumulation into the
    # resident output tile) to keep it exercised at small shapes.
    batch2, in2, out2 = 8, 256, 256
    weight2 = make_projection_weight(kw2, in2, out2)
    weight2_t = pack_projection_weight(weight2)
    x2 = jax.random.normal(kx2, (batch2, in2), dtype=jnp.float32)

    y2 = jax.block_until_ready(projection_forward(x2, weight2_t, tk=128))
    y2_ref = x2 @ weight2.T
    assert jnp.allclose(y2, y2_ref, atol=1e-5, rtol=1e-5)

    # TODO(synk): the VSA tensor class wrapper (MAPTensor/HRRTensor/VTBTensor)
    # is a metadata tag with no compute; the kernel returns a plain array.
    print("KERNEL_OK")
</pallas_src>

<mosaic_0001>
module attributes {stable_mosaic.version = 11 : i64} {
  func.func @_proj_kernel_single(%arg0: i32, %arg1: i32, %arg2: memref<8x32xf32, #tpu.memory_space<vmem>>, %arg3: memref<32x128xf32, #tpu.memory_space<vmem>>, %arg4: memref<8x128xf32, #tpu.memory_space<vmem>>) attributes {dimension_semantics = [#tpu.dimension_semantics<parallel>, #tpu.dimension_semantics<parallel>], iteration_bounds = array<i64: 1, 2>, scalar_prefetch = 0 : i64, scratch_operands = 0 : i64, tpu.core_type = #tpu.core_type<tc>, window_params = [{transform_indices = @transform_0, window_bounds = array<i64: 8, 32>}, {transform_indices = @transform_1, window_bounds = array<i64: 32, 128>}, {transform_indices = @transform_2, window_bounds = array<i64: 8, 128>}]} {
    %c0 = arith.constant 0 : index
    %c0_0 = arith.constant 0 : index
    %0 = vector.load %arg2[%c0, %c0_0] : memref<8x32xf32, #tpu.memory_space<vmem>>, vector<8x32xf32>
    %c0_1 = arith.constant 0 : index
    %c0_2 = arith.constant 0 : index
    %1 = vector.load %arg3[%c0_1, %c0_2] : memref<32x128xf32, #tpu.memory_space<vmem>>, vector<32x128xf32>
    %cst = arith.constant dense<0.000000e+00> : vector<8x128xf32>
    %2 = tpu.matmul %0, %1, %cst {dimension_numbers = #tpu.dot_dimension_numbers<[1], [0], [0], [1], [0, 0, 1, 1], [], []>} : vector<8x32xf32>, vector<32x128xf32>, vector<8x128xf32> -> vector<8x128xf32>
    %c0_3 = arith.constant 0 : index
    %c0_4 = arith.constant 0 : index
    %3 = vector.load %arg4[%c0_3, %c0_4] : memref<8x128xf32, #tpu.memory_space<vmem>>, vector<8x128xf32>
    tpu.vector_store %arg4[%c0_3, %c0_4], %2 {strides = array<i32>} : memref<8x128xf32, #tpu.memory_space<vmem>>, vector<8x128xf32>,
    return
  }
  func.func @transform_0(%arg0: i32, %arg1: i32) -> (i32, i32) {
    %c0_i32 = arith.constant 0 : i32
    %c0_i32_0 = arith.constant 0 : i32
    return %arg0, %c0_i32 : i32, i32
  }
  func.func @transform_1(%arg0: i32, %arg1: i32) -> (i32, i32) {
    %c0_i32 = arith.constant 0 : i32
    %c0_i32_0 = arith.constant 0 : i32
    return %c0_i32, %arg1 : i32, i32
  }
  func.func @transform_2(%arg0: i32, %arg1: i32) -> (i32, i32) {
    %c0_i32 = arith.constant 0 : i32
    return %arg0, %arg1 : i32, i32
  }
}

</mosaic_0001>

<bundles_post_ra>
// kernel: tpu_custom_call.1
= control target key start
LH: loop header
LB: loop body
LE: loop exit
PB: predicated region body
PF: predicated region fallthrough
CT: control target
= control target key end

     0   :  { %7 = vsyncpa [#allocation3], 0  ;;  %s892_s0 = inlined_call_operand.hbm [shape: f32[8,32], index: 0, kind: input, shape index: {}]   ;;  %s893_s1 = inlined_call_operand.hbm [shape: f32[32,256], index: 1, kind: input, shape index: {}]   ;;  %s894_s2 = inlined_call_operand.hbm [shape: f32[8,256], index: 2, kind: output, shape index: {}]  }
   0x1   :  { %8 = vsyncpa [#allocation6], 0 }
   0x2   :  { %10 = vsyncpa [#allocation6 + $0x1], 0 }
   0x3   :  { %11 = vsyncpa [#allocation4], 0 }
   0x4   :  { %13 = vsyncpa [#allocation4 + $0x1], 0  ;;  %s672_s9 = smov 0   ;;  %s674_s10 = smov 0  }
   0x5   :  { %s676_s11 = smov 0   ;;  %s678_s12 = smov 0  }
   0x6   :  { %s680_s13 = smov 0   ;;  %s682_s14 = smov 0  }
   0x7 LB: > { %s385_s15 = sadd.s32 4294967295, %s646_s14   ;;  %s386_s16 = sadd.s32 4294967294, %s646_s14   ;;  %s646_s14 = sphi %s682_s14, %s19_s14   ;;  %s642_s13 = sphi %s680_s13, %s922_s13   ;;  %s638_s12 = sphi %s678_s12, %s921_s12   ;;  %s634_s11 = sphi %s676_s11, %s920_s11   ;;  %s630_s10 = sphi %s674_s10, %s919_s10   ;;  %s626_s9 = sphi %s672_s9, %s918_s9  }
   0x8   : > { %s64_s17 = sadd.s32 1, %s634_s11  ;;  %p71_p0 = scmp.ne.s32.totalorder %s634_s11, %s630_s10 }
   0x9   : > { %p72_p1 = scmp.eq.s32.totalorder %s646_s14, 0  ;;  %p77_p2 = scmp.ne.s32.totalorder %s630_s10, %s626_s9 }
   0xa   : > { %p710_p3 = scmp.eq.s32.totalorder %s385_s15, 0  ;;  %p103_p4 = scmp.eq.s32.totalorder %s385_s15, 1 }
   0xb   : > { %p714_p5 = por %p72_p1, %p71_p0  ;;  %p109_p6 = scmp.eq.s32.totalorder %s386_s16, 1 }
   0xc   : > { %s901_s18 = scalar_select %p710_p3, 1, 0 }
   0xd   : > { %p720_p7 = por %p710_p3, %p77_p2  ;;  %p724_p8 = por %p103_p4, %p71_p0 }
   0xe   : > { %p728_p9 = por %p109_p6, %p77_p2  ;;  %p387_p10 = scmp.ge.s32.totalorder %s646_s14, 1 }
   0xf   : > { %s903_s20 = scalar_select %p720_p7, 1, 0 }
  0x10   : > { %s904_s21 = scalar_select %p724_p8, 1, 0 }
  0x11   : > { %s905_s22 = scalar_select %p728_p9, 1, 0 }
  0x12   : > { %p116_p11 = scmp.lt.s32.totalorder %s646_s14, 3  ;;  %s648_s24 = smov [#allocation2]  }
  0x13   : > { %s131_s25 = sshll.u32 %s648_s24, 4  ;;  %p444_p1 = scmp.lt.s32.totalorder %s646_s14, 2  ;;  %s132_s25 = int_to_ptr.vmem [resolvable:$true] %s131_s25 }
  0x14   : > { %p735_p13 = pnand %p387_p10, %p116_p11  ;;  %s28_s28 = sadd.s32 1, %s642_s13 }
  0x15   : > { %p744_p4 = pnand %p444_p1, %p714_p5  ;;  %p755_p6 = scmp.ge.s32.totalorder %s28_s28, 2 }
  0x16   : > { %s906_s23 = scalar_select %p735_p13, 1, 0 }
  0x17   : > { %p431_p0 = pneg %p735_p13  ;;  %s142_s30 = sand.u32 1, %s634_s11  }
  0x18   : > { %s907_s26 = scalar_select %p744_p4, 1, 0 }
  0x19   : > { %p750_p2 = pnand %p431_p0, %p710_p3  ;;  %s502_s5 = scalar_lea.hbm %s892_s0, 128 }
  0x1a   : > { %s909_s29 = scalar_select %p755_p6, 1, 0 }
  0x1b   : > { %p503_p5 = scmp.ne.s32.totalorder %s892_s0, %s502_s5  ;;  %p504_p10 = pneg %p750_p2 }
  0x1c   : > { %p509_p0 = scmp.lt.u32.totalorder %s502_s5, %s892_s0 }
  0x1d   : > { %p505_p11 = pnand %p504_p10, %p503_p5 }
  0x1f   : > { %p506_p1 = pneg %p505_p11 }
  0x21   : > { %p511_p12 = pnand %p509_p0, %p506_p1 }
  0x23   : > { %514 = shalt.err (!%p511_p12)
}
  0x24   : > { %s515_s16 = scalar_lea.vmem %s132_s25, 128  ;;  %p523_p3 = scmp.lt.s32.totalorder %s132_s25, %s132_s25 }
  0x25   : > { %p516_p9 = scmp.ne.s32.totalorder %s132_s25, %s515_s16  ;;  %p524_p13 = scmp.lt.s32.totalorder %s515_s16, %s515_s16 }
  0x27   : > { %p518_p8 = pnand %p516_p9, %p504_p10  ;;  %p525_p4 = por %p524_p13, %p523_p3 }
  0x29   : > { %p519_p7 = pneg %p518_p8 }
  0x2b   : > { %p526_p6 = pnand %p525_p4, %p519_p7 }
  0x2d   : > { %529 = shalt.err (!%p526_p6)
}
  0x2e   : > { %434 = dma.hbm_to_vmem [thread:$0]  (!%p750_p2), %s892_s0, 128, %s132_s25, [#allocation3]  }
  0x2f   : > { %p910_p9 = scmp.ne.s32.totalorder %s909_s29, 0  ;;  %s390_s3 = sshll.u32 %s142_s30, 5 }
  0x30   : > { %s391_s5 = sshll.u32 %s642_s13, 7  ;;  %s146_s8 = scalar_lea.vmem [#allocation5], %s390_s3 }
  0x31   : > { %s924_s28 = smov (%p910_p9, %s28_s28), 0  ;;  %s786_s7 = scalar_lea.hbm %s893_s1, %s391_s5 }
  0x32   : > { %s61_s4 = ssub.s32 %s642_s13, %s924_s28  ;;  %s152_s15 = sshll.u32 %s146_s8, 4  ;;  %s793_s15 = int_to_ptr.vmem [resolvable:$true] %s152_s15 }
  0x33   : > { %p62_p3 = scmp.eq.s32.totalorder %s61_s4, 0  ;;  %s795_s29 = scalar_lea.sflag [#allocation6], %s142_s30 }
  0x34   : > { %s530_s16 = scalar_lea.hbm %s786_s7, 512  ;;  %p911_p8 = scmp.ne.s32.totalorder %s907_s26, 0 }
  0x35   : > { %s791_s25 = scalar_select %p62_p3, %s634_s11, %s64_s17  }
  0x36   : > { %p531_p7 = scmp.ne.s32.totalorder %s786_s7, %s530_s16  ;;  %p532_p12 = pneg %p911_p8 }
  0x37   : > { %s535_s3 = scalar_lea.hbm %s893_s1, 1024  ;;  %p536_p2 = scmp.lt.u32.totalorder %s786_s7, %s893_s1 }
  0x38   : > { %p533_p13 = pnand %p532_p12, %p531_p7  ;;  %p537_p6 = scmp.lt.u32.totalorder %s535_s3, %s530_s16 }
  0x39   : > { %p539_p10 = scmp.lt.u32.totalorder %s530_s16, %s786_s7 }
  0x3a   : > { %p534_p4 = pneg %p533_p13  ;;  %p538_p5 = por %p537_p6, %p536_p2 }
  0x3c   : > { %p540_p11 = por %p539_p10, %p538_p5 }
  0x3e   : > { %p541_p1 = pnand %p540_p11, %p534_p4 }
  0x40   : > { %544 = shalt.err (!%p541_p1)
}
  0x41   : > { %s545_s17 = scalar_lea.vmem %s793_s15, 512  ;;  %s649_s30 = smov [#allocation5]  }
  0x42   : > { %p546_p0 = scmp.ne.s32.totalorder %s793_s15, %s545_s17  ;;  %s550_s27 = sshll.u32 %s649_s30, 4  ;;  %s551_s27 = int_to_ptr.vmem [resolvable:$false] %s550_s27 }
  0x43   : > { %s552_s6 = scalar_lea.vmem %s551_s27, 1024  ;;  %p553_p7 = scmp.lt.s32.totalorder %s793_s15, %s551_s27 }
  0x44   : > { %p548_p9 = pnand %p546_p0, %p532_p12  ;;  %p554_p13 = scmp.lt.s32.totalorder %s552_s6, %s545_s17 }
  0x46   : > { %p549_p3 = pneg %p548_p9  ;;  %p555_p2 = por %p554_p13, %p553_p7 }
  0x48   : > { %p556_p6 = pnand %p555_p2, %p549_p3 }
  0x4a   : > { %559 = shalt.err (!%p556_p6)
}
  0x4b   : > { %s650_s8 = smov 256   ;;  %s651_s16 = smov 128  }
  0x4c   : > { %s652_s19 = smov 8   ;;  %p912_p12 = scmp.ne.s32.totalorder %s906_s23, 0 }
  0x4d   : > { %438 = dma.hbm_to_vmem [thread:$0]  (!%p911_p8), %s786_s7, 512, %s793_s15, %s795_s29, %s650_s8, %s651_s16, %s652_s19  }
  0x4e   : > { %164 = sbr.rel (%p912_p12) target bundleno = 326 (0x146), region = 28  ;;  %p913_p4 = scmp.ne.s32.totalorder (!%p912_p12), %s901_s18, 0 }
  0x55   : > { %613 = dma.done.wait (%p913_p4), [#allocation3], 128  }
  0x56   : > { %615 = vsyncadd (%p913_p4), [#allocation3], 4294967168  ;;  %s830_s24 = sand.u32 1, %s630_s10   ;;  %p914_p5 = scmp.ne.s32.totalorder %s903_s20, 0 }
  0x57   : > { %s394_s3 = sshll.u32 %s830_s24, 5  ;;  %s171_s4 = scalar_lea.sflag [#allocation6], %s830_s24 }
  0x58   : > { %s174_s5 = scalar_lea.vmem [#allocation5], %s394_s3 }
  0x59   : > { %617 = dma.done.wait (%p914_p5), %s171_s4, 512  }
  0x5a   : > { %619 = vsyncadd (%p914_p5), %s171_s4, 4294966784  ;;  %v653_v0 = vmov 0.0|0.0   ;;  %vm654_vm0 = vmmov 0   ;;  %v655_v1 = vmov 0.0   ;;  %v196_v2 = vld [vmem:[%s174_s5] sm:$0xff]  ;;  %v197_v3 = vld [vmem:[%s174_s5 + $0x8] sm:$0xff] }
  0x5b   : > { %417 = vmatprep.subr.bf16.mxu0 %v653_v0  ;;  %414 = vmatprep.mubr.msk.f32.mxu0 %vm654_vm0, %v655_v1  ;;  %v198_v4 = vld [vmem:[%s174_s5 + $0x10] sm:$0xff]  ;;  %v418_v5 = vpack.c.bf16 %v197_v3, %v196_v2  ;;  %v199_v6 = vld [vmem:[%s174_s5 + $0x18] sm:$0xff]  ;;  %vm200_vm1 = vcmask 261120   ;;  %s395_s18 = sshll.u32 %s830_s24, 3  ;;  %s398_s26 = sshll.u32 %s638_s12, 7 }
  0x5c   : > { %v421_v7 = vpack.c.bf16 %v199_v6, %v198_v4  ;;  %v195_v8 = vld [vmem:[#allocation2] sm:$0xff]  ;;  %s194_s20 = scalar_lea.vmem [#allocation7], %s395_s18  ;;  %s845_s29 = scalar_lea.hbm %s894_s2, %s398_s26 }
  0x5d   : > { %419 = vmatpush3.bf16.msra.mxu0 %v418_v5  ;;  %s291_s23 = sshll.u32 %s194_s20, 4  ;;  %s276_s17 = scalar_lea.sflag [#allocation4], %s830_s24  ;;  %s840_s23 = int_to_ptr.vmem [resolvable:$true] %s291_s23 }
  0x5e   : > { %420 = vmatprep.subr.bf16.mxu0 %v653_v0  ;;  %s560_s30 = scalar_lea.vmem %s840_s23, 128  ;;  %p915_p10 = scmp.ne.s32.totalorder %s904_s21, 0 }
  0x5f   : > { %p561_p8 = scmp.ne.s32.totalorder %s840_s23, %s560_s30  ;;  %s656_s12 = smov [#allocation7]  }
  0x60   : > { %s564_s27 = sshll.u32 %s656_s12, 4  ;;  %s565_s27 = int_to_ptr.vmem [resolvable:$false] %s564_s27 }
  0x61   : > { %422 = vmatpush3.bf16.msra.mxu0 %v421_v7  ;;  %p562_p11 = pnand %p561_p8, %p915_p10  ;;  %s566_s6 = scalar_lea.vmem %s565_s27, 256 }
  0x62   : > { %p567_p0 = scmp.lt.s32.totalorder %s840_s23, %s565_s27  ;;  %p568_p9 = scmp.lt.s32.totalorder %s566_s6, %s560_s30 }
  0x63   : > { %p563_p1 = pneg %p562_p11 }
  0x64   : > { %415 = vmatmul.mubr.msk.f32.vlgmr.msra.gmra.mrb[0].mxu0 %vm200_vm1, %v195_v8  ;;  %p569_p3 = por %p568_p9, %p567_p0 }
  0x66   : > { %p570_p7 = pnand %p569_p3, %p563_p1 }
 0x137   : > { %v270_v9 = vpop.f32.mrb[0].mxu0 }
 0x138   : > { %274 = vst [vmem:[%s194_s20] sm:$0xff] %v270_v9  ;;  %v416_v10 = vpop.f32.mrb[1].mxu0 }
 0x139   : > { %573 = shalt.err (!%p570_p7)
}
 0x13a   : > { %s574_s8 = scalar_lea.hbm %s845_s29, 128  ;;  %s578_s24 = scalar_lea.hbm %s894_s2, 256 }
 0x13b   : > { %p575_p13 = scmp.ne.s32.totalorder %s845_s29, %s574_s8  ;;  %p579_p12 = scmp.lt.u32.totalorder %s845_s29, %s894_s2 }
 0x13c   : > { %p580_p4 = scmp.lt.u32.totalorder %s578_s24, %s574_s8  ;;  %p582_p8 = scmp.lt.u32.totalorder %s574_s8, %s845_s29 }
 0x13d   : > { %p576_p2 = pnand %p575_p13, %p915_p10 }
 0x13e   : > { %p581_p5 = por %p580_p4, %p579_p12 }
 0x13f   : > { %p577_p6 = pneg %p576_p2 }
 0x140   : > { %p583_p11 = por %p582_p8, %p581_p5 }
 0x142   : > { %p584_p1 = pnand %p583_p11, %p577_p6 }
 0x144   : > { %587 = shalt.err (!%p584_p1)
}
 0x145   : > { %429 = dma.vmem_to_hbm [thread:$0]  (%p915_p10), %s840_s23, 128, %s845_s29, %s276_s17  }
 0x146 PF: > { %s303_s5 = sand.u32 1, %s626_s9   ;;  %p916_p0 = scmp.ne.s32.totalorder %s905_s22, 0 }
 0x147   : > { %p917_p9 = scmp.ge.s32.totalorder %s646_s14, 2  ;;  %s304_s18 = scalar_lea.sflag [#allocation4], %s303_s5 }
 0x149   : > { %p440_p3 = pnand %p917_p9, %p916_p0 }
 0x14b   : > { %621 = dma.done.wait (!%p440_p3), %s304_s18, 128  }
 0x14c   : > { %623 = vsyncadd (!%p440_p3), %s304_s18, 4294967168  ;;  %s19_s14 = sadd.s32 1, %s646_s14   ;;  %s918_s9 = smov %s630_s10 }
 0x14d   : > { %p16_p7 = scmp.ge.s32.totalorder %s19_s14, 4   ;;  %s919_s10 = smov %s634_s11 }
 0x14e   : > { %s920_s11 = smov %s791_s25  ;;  %s921_s12 = smov %s642_s13 }
 0x14f   : > { %s922_s13 = smov %s924_s28  ;;  %18 = sbr.rel (!%p16_p7) target bundleno = 7 (0x7), region = 79 }
 0x156   :  { %309 = vsyncpa [#allocation3], 1 }
 0x157   :  { %311 = vsyncpa [#allocation3 + $0x1], 1 }
 0x158   :  { %312 = vsyncpa [#allocation6], 1 }
 0x159   :  { %314 = vsyncpa [#allocation6 + $0x1], 1 }
 0x15a   :  { %315 = vsyncpa [#allocation4], 1 }
 0x15b   :  { %317 = vsyncpa [#allocation4 + $0x1], 1 }

</bundles_post_ra>
